<compile_context>
chip_gen: v5e
topology: v5e:2x2
jax: 0.10.0
libtpu: 0.0.40
codegen_flags: <defaults>
</compile_context>

<pallas_src>
import functools

import jax
import jax.numpy as jnp
from jax.experimental import pallas as pl
from jax.experimental.pallas import tpu as pltpu

_LANES = 128


def _round_up(x, m):
    return (x + m - 1) // m * m


def _afn_kernel(f_ref, out_ref, ssq_ref, *, delta, n_true):
    i = pl.program_id(0)            # N-tile index (parallel)
    k = pl.program_id(1)            # F-tile index (reduction, innermost)
    n_tile = ssq_ref.shape[0]
    tk = f_ref.shape[1]

    @pl.when(k == 0)
    def _():
        ssq_ref[...] = jnp.zeros_like(ssq_ref)

    blk = f_ref[...].astype(jnp.float32)        # (n_tile, tk)
    sq = blk * blk
    # Lane-dense accumulation: fold tk lanes onto a 128-wide accumulator using
    # static 128-lane slices (VPU only; no per-step XLU reduce or masked 1-lane
    # store).  Tree-fold to keep the dependence chain short.
    parts = [sq[:, j * _LANES:(j + 1) * _LANES] for j in range(tk // _LANES)]
    while len(parts) > 1:
        nxt = [parts[t] + parts[t + 1] for t in range(0, len(parts) - 1, 2)]
        if len(parts) % 2:
            nxt.append(parts[-1])
        parts = nxt
    ssq_ref[...] += parts[0]

    @pl.when(k == pl.num_programs(1) - 1)
    def _():
        row_ssq = jnp.sum(ssq_ref[...], axis=-1, keepdims=True)    # (n_tile, 1)
        norm = jnp.sqrt(row_ssq)                                   # per-row L2 norm
        # TODO(synk): .detach() only affects gradients; the forward value is
        # identical.  A jax.custom_vjp with a backward kernel would be needed for
        # jax.grad (Pallas kernels are not auto-differentiable).
        radius = jax.lax.stop_gradient(norm) + delta               # (n_tile, 1)
        loss_terms = (norm - radius) ** 2                          # (n_tile, 1)
        # Mask rows that are zero-padding beyond the true batch size.
        row_ids = i * n_tile + jax.lax.broadcasted_iota(jnp.int32, (n_tile, 1), 0)
        loss_terms = jnp.where(row_ids < n_true, loss_terms, 0.0)
        out_ref[...] = jnp.sum(loss_terms).reshape(1, 1, 1)


def _choose_tiles(N, F, itemsize, *, max_tk=4096, max_n_tile=512,
                  tile_budget_bytes=4 * 1024 * 1024):
    """Pick (n_tile, tk) so a double-buffered input tile stays within budget."""
    sublane = {4: 8, 2: 16, 1: 32}.get(itemsize, 8)

    # Feature tiling: big lane-aligned tiles for an HBM-bound streaming reduction.
    f_lanes = _round_up(F, _LANES)
    tk_cap = min(f_lanes, max_tk)
    kf = max(1, -(-f_lanes // tk_cap))                  # number of F tiles
    tk = _round_up(-(-f_lanes // kf), _LANES)

    # Row tiling: as many rows as fit in the per-buffer budget (caps VMEM
    # independently of N, and gives a megacore-shardable parallel grid axis).
    n_cap = max(sublane, (tile_budget_bytes // (tk * itemsize)) // sublane * sublane)
    n_cap = min(n_cap, _round_up(max_n_tile, sublane))
    n_tile = min(_round_up(N, sublane), n_cap)
    return n_tile, tk, kf


def _afn_row_loss_sum(f, delta):
    """sum_i (||f_i|| - (stop_grad(||f_i||) + delta))^2 for f of shape (N, F)."""
    N, F = f.shape
    itemsize = jnp.dtype(f.dtype).itemsize
    n_tile, tk, kf = _choose_tiles(N, F, itemsize)

    f_pad = kf * tk
    n_pad = _round_up(N, n_tile)
    kn = n_pad // n_tile

    if (n_pad, f_pad) != (N, F):
        # Zero padding: zeros add nothing to the per-row sum of squares; padded
        # rows are masked out in the kernel epilogue.
        f = jnp.pad(f, ((0, n_pad - N), (0, f_pad - F)))

    kernel = functools.partial(_afn_kernel, delta=float(delta), n_true=N)
    partials = pl.pallas_call(
        kernel,
        out_shape=jax.ShapeDtypeStruct((kn, 1, 1), jnp.float32),
        grid_spec=pltpu.PrefetchScalarGridSpec(
            num_scalar_prefetch=0,
            grid=(kn, kf),
            in_specs=[pl.BlockSpec((n_tile, tk), lambda i, k: (i, k))],
            out_specs=pl.BlockSpec((1, 1, 1), lambda i, k: (i, 0, 0)),
            scratch_shapes=[pltpu.VMEM((n_tile, _LANES), jnp.float32)],
        ),
        compiler_params=pltpu.CompilerParams(
            dimension_semantics=("parallel", "arbitrary"),
            vmem_limit_bytes=32 * 1024 * 1024,
        ),
    )(f)
    return jnp.sum(partials)


def adaptive_feature_norm(f, delta):
    """Scalar Stepwise Adaptive Feature Norm loss for features f of shape (N, F)."""
    return _afn_row_loss_sum(f, delta) / f.shape[0]


def afn_reference(f, delta):
    norm = jnp.linalg.norm(f.astype(jnp.float32), axis=1)
    radius = jax.lax.stop_gradient(norm) + delta
    return jnp.mean((norm - radius) ** 2)


if __name__ == "__main__":
    key = jax.random.PRNGKey(0)
    key_s, key_t, key_o = jax.random.split(key, 3)

    # Shapes from the module docstring example (kept small).
    N, F = 32, 1000
    delta = 1.0

    f_s = jax.random.normal(key_s, (N, F), dtype=jnp.float32)
    f_t = jax.random.normal(key_t, (N, F), dtype=jnp.float32)

    # Batch source + target features into ONE pallas_call (amortizes launch /
    # pipeline-fill overhead).  Since N_s == N_t:
    #   loss_s + loss_t == (sum of all per-row terms) / N.
    norm_loss = _afn_row_loss_sum(jnp.concatenate([f_s, f_t], axis=0), delta) / N
    norm_loss = jax.block_until_ready(norm_loss)

    ref = afn_reference(f_s, delta) + afn_reference(f_t, delta)
    assert jnp.allclose(norm_loss, ref, rtol=1e-5, atol=1e-5), (norm_loss, ref)

    # Per-tensor API on a ragged shape (exercises row masking + feature padding).
    f_odd = jax.random.normal(key_o, (10, 200), dtype=jnp.float32)
    loss_odd = jax.block_until_ready(adaptive_feature_norm(f_odd, delta))
    ref_odd = afn_reference(f_odd, delta)
    assert jnp.allclose(loss_odd, ref_odd, rtol=1e-5, atol=1e-5), (loss_odd, ref_odd)

    print("KERNEL_OK")
</pallas_src>

<mosaic_0001>
module attributes {stable_mosaic.version = 11 : i64} {
  func.func @_afn_kernel(%arg0: i32, %arg1: i32, %arg2: memref<64x1024xf32, #tpu.memory_space<vmem>>, %arg3: memref<1x1x1xf32, #tpu.memory_space<vmem>>, %arg4: memref<64x128xf32, #tpu.memory_space<vmem>>) attributes {dimension_semantics = [#tpu.dimension_semantics<parallel>, #tpu.dimension_semantics<arbitrary>], iteration_bounds = array<i64: 1, 1>, scalar_prefetch = 0 : i64, scratch_operands = 1 : i64, tpu.core_type = #tpu.core_type<tc>, window_params = [{transform_indices = @transform_0, window_bounds = array<i64: 64, 1024>}, {transform_indices = @transform_1, window_bounds = array<i64: 1, 1, 1>}]} {
    %c0_i32 = arith.constant 0 : i32
    %0 = arith.cmpi eq, %arg1, %c0_i32 : i32
    %1 = arith.extui %0 : i1 to i32
    %c0_i32_0 = arith.constant 0 : i32
    %2 = arith.cmpi ne, %1, %c0_i32_0 : i32
    scf.if %2 {
      %cst = arith.constant 0.000000e+00 : f32
      %26 = vector.broadcast %cst : f32 to vector<64x128xf32>
      %c0_8 = arith.constant 0 : index
      %c0_9 = arith.constant 0 : index
      %27 = vector.load %arg4[%c0_8, %c0_9] : memref<64x128xf32, #tpu.memory_space<vmem>>, vector<64x128xf32>
      tpu.vector_store %arg4[%c0_8, %c0_9], %26 {strides = array<i32>} : memref<64x128xf32, #tpu.memory_space<vmem>>, vector<64x128xf32>,
    } else {
    }
    %c0 = arith.constant 0 : index
    %c0_1 = arith.constant 0 : index
    %3 = vector.load %arg2[%c0, %c0_1] : memref<64x1024xf32, #tpu.memory_space<vmem>>, vector<64x1024xf32>
    %4 = arith.mulf %3, %3 : vector<64x1024xf32>
    %5 = vector.extract_strided_slice %4 {offsets = [0, 0], sizes = [64, 128], strides = [1, 1]} : vector<64x1024xf32> to vector<64x128xf32>
    %6 = vector.extract_strided_slice %4 {offsets = [0, 128], sizes = [64, 128], strides = [1, 1]} : vector<64x1024xf32> to vector<64x128xf32>
    %7 = vector.extract_strided_slice %4 {offsets = [0, 256], sizes = [64, 128], strides = [1, 1]} : vector<64x1024xf32> to vector<64x128xf32>
    %8 = vector.extract_strided_slice %4 {offsets = [0, 384], sizes = [64, 128], strides = [1, 1]} : vector<64x1024xf32> to vector<64x128xf32>
    %9 = vector.extract_strided_slice %4 {offsets = [0, 512], sizes = [64, 128], strides = [1, 1]} : vector<64x1024xf32> to vector<64x128xf32>
    %10 = vector.extract_strided_slice %4 {offsets = [0, 640], sizes = [64, 128], strides = [1, 1]} : vector<64x1024xf32> to vector<64x128xf32>
    %11 = vector.extract_strided_slice %4 {offsets = [0, 768], sizes = [64, 128], strides = [1, 1]} : vector<64x1024xf32> to vector<64x128xf32>
    %12 = vector.extract_strided_slice %4 {offsets = [0, 896], sizes = [64, 128], strides = [1, 1]} : vector<64x1024xf32> to vector<64x128xf32>
    %13 = arith.addf %5, %6 : vector<64x128xf32>
    %14 = arith.addf %7, %8 : vector<64x128xf32>
    %15 = arith.addf %9, %10 : vector<64x128xf32>
    %16 = arith.addf %11, %12 : vector<64x128xf32>
    %17 = arith.addf %13, %14 : vector<64x128xf32>
    %18 = arith.addf %15, %16 : vector<64x128xf32>
    %19 = arith.addf %17, %18 : vector<64x128xf32>
    %c0_2 = arith.constant 0 : index
    %c0_3 = arith.constant 0 : index
    %20 = vector.load %arg4[%c0_2, %c0_3] : memref<64x128xf32, #tpu.memory_space<vmem>>, vector<64x128xf32>
    %21 = arith.addf %20, %19 : vector<64x128xf32>
    %c0_4 = arith.constant 0 : index
    %c0_5 = arith.constant 0 : index
    %22 = vector.load %arg4[%c0_4, %c0_5] : memref<64x128xf32, #tpu.memory_space<vmem>>, vector<64x128xf32>
    tpu.vector_store %arg4[%c0_4, %c0_5], %21 {strides = array<i32>} : memref<64x128xf32, #tpu.memory_space<vmem>>, vector<64x128xf32>,
    %c0_i32_6 = arith.constant 0 : i32
    %23 = arith.cmpi eq, %arg1, %c0_i32_6 : i32
    %24 = arith.extui %23 : i1 to i32
    %c0_i32_7 = arith.constant 0 : i32
    %25 = arith.cmpi ne, %24, %c0_i32_7 : i32
    scf.if %25 {
      %c0_8 = arith.constant 0 : index
      %c0_9 = arith.constant 0 : index
      %26 = vector.load %arg4[%c0_8, %c0_9] : memref<64x128xf32, #tpu.memory_space<vmem>>, vector<64x128xf32>
      %cst = arith.constant dense<0.000000e+00> : vector<64xf32>
      %27 = vector.multi_reduction <add>, %26, %cst [1] : vector<64x128xf32> to vector<64xf32>
      %28 = vector.shape_cast %27 : vector<64xf32> to vector<64x1xf32>
      %29 = math.sqrt %28 : vector<64x1xf32>
      %cst_10 = arith.constant 1.000000e+00 : f32
      %30 = vector.broadcast %cst_10 : f32 to vector<64x1xf32>
      %31 = arith.addf %29, %30 : vector<64x1xf32>
      %32 = arith.subf %29, %31 : vector<64x1xf32>
      %33 = arith.mulf %32, %32 : vector<64x1xf32>
      %c64_i32 = arith.constant 64 : i32
      %34 = arith.muli %arg0, %c64_i32 : i32
      %35 = tpu.iota {dimensions = array<i32: 0>} : vector<64x1xi32>
      %36 = vector.broadcast %34 : i32 to vector<64x1xi32>
      %37 = arith.addi %36, %35 : vector<64x1xi32>
      %c64_i32_11 = arith.constant 64 : i32
      %38 = vector.broadcast %c64_i32_11 : i32 to vector<64x1xi32>
      %39 = arith.cmpi slt, %37, %38 : vector<64x1xi32>
      %cst_12 = arith.constant 0.000000e+00 : f32
      %40 = vector.broadcast %cst_12 : f32 to vector<64x1xf32>
      %41 = arith.select %39, %33, %40 : vector<64x1xi1>, vector<64x1xf32>
      %42 = vector.shape_cast %41 : vector<64x1xf32> to vector<1x64x1xf32>
      %cst_13 = arith.constant dense<0.000000e+00> : vector<1xf32>
      %43 = vector.multi_reduction <add>, %42, %cst_13 [1, 2] : vector<1x64x1xf32> to vector<1xf32>
      %44 = vector.shape_cast %43 : vector<1xf32> to vector<1x1x1xf32>
      %45 = vector.extract %44[0, 0, 0] : f32 from vector<1x1x1xf32>
      %46 = vector.broadcast %45 : f32 to vector<1x1x1xf32>
      %c0_14 = arith.constant 0 : index
      %c0_15 = arith.constant 0 : index
      %c0_16 = arith.constant 0 : index
      %47 = vector.load %arg3[%c0_14, %c0_15, %c0_16] : memref<1x1x1xf32, #tpu.memory_space<vmem>>, vector<1x1x1xf32>
      tpu.vector_store %arg3[%c0_14, %c0_15, %c0_16], %46 {strides = array<i32>} : memref<1x1x1xf32, #tpu.memory_space<vmem>>, vector<1x1x1xf32>,
    } else {
    }
    return
  }
  func.func @transform_0(%arg0: i32, %arg1: i32) -> (i32, i32) {
    %c0_i32 = arith.constant 0 : i32
    return %arg0, %arg1 : i32, i32
  }
  func.func @transform_1(%arg0: i32, %arg1: i32) -> (i32, i32, i32) {
    %c0_i32 = arith.constant 0 : i32
    %c0_i32_0 = arith.constant 0 : i32
    %c0_i32_1 = arith.constant 0 : i32
    return %arg0, %c0_i32, %c0_i32_0 : i32, i32, i32
  }
}

</mosaic_0001>

<bundles_post_ra>
// kernel: tpu_custom_call.1
= control target key start
LH: loop header
LB: loop body
LE: loop exit
PB: predicated region body
PF: predicated region fallthrough
CT: control target
= control target key end

     0   :  { %6 = vsyncpa [#allocation4], 0  ;;  %s647_s0 = inlined_call_operand.hbm [shape: f32[64,1024], index: 0, kind: input, shape index: {}]   ;;  %s648_s1 = inlined_call_operand.hbm [shape: f32[1,1,1], index: 1, kind: output, shape index: {}]  }
   0x1   :  { %7 = vsyncpa [#allocation5], 0  ;;  %s12_s8 = sshll.u32 %s647_s0, 4  ;;  %s546_s9 = smov [#allocation3]   ;;  %s13_s8 = int_to_ptr.hbm [resolvable:$true] %s12_s8 }
   0x2   :  { %s14_s10 = sshll.u32 %s546_s9, 4  ;;  %s547_s11 = smov 1024   ;;  %s15_s10 = int_to_ptr.vmem [resolvable:$true] %s14_s10 }
   0x3   :  { %s548_s12 = smov 64  }
   0x4   :  { %20 = dma.hbm_to_vmem [thread:$0]  %s13_s8, 8192, %s15_s10, [#allocation4], %s547_s11, %s547_s11, %s548_s12  }
   0x5   :  { %542 = dma.done.wait [#allocation4], 8192  }
   0x6   :  { %543 = vsyncadd [#allocation4], 4294959104  ;;  %v69_v0 = vld [vmem:[#allocation3 + $0x100] sm:$0xff]  ;;  %v70_v1 = vld [vmem:[#allocation3 + $0x108] sm:$0xff]  ;;  %vm427_vm13 = vcmask 7168   ;;  %s549_s0 = smov [#allocation6]  }
   0x7   :  { %v71_v2 = vld [vmem:[#allocation3 + $0x110] sm:$0xff]  ;;  %v72_v3 = vld [vmem:[#allocation3 + $0x118] sm:$0xff]  ;;  %v73_v4 = vld [vmem:[#allocation3 + $0x120] sm:$0xff]  ;;  %v133_v6 = vmul.f32 %v69_v0, %v69_v0  ;;  %v134_v7 = vmul.f32 %v70_v1, %v70_v1  ;;  %s460_s13 = sshll.u32 %s549_s0, 4  ;;  %s462_s16 = sshll.u32 %s648_s1, 4  ;;  %s461_s13 = int_to_ptr.vmem [resolvable:$true] %s460_s13  ;;  %s463_s16 = int_to_ptr.hbm [resolvable:$true] %s462_s16 }
   0x8   :  { %v74_v5 = vld [vmem:[#allocation3 + $0x128] sm:$0xff]  ;;  %v135_v8 = vmul.f32 %v71_v2, %v71_v2  ;;  %v75_v9 = vld [vmem:[#allocation3 + $0x130] sm:$0xff]  ;;  %v76_v10 = vld [vmem:[#allocation3 + $0x138] sm:$0xff]  ;;  %v136_v11 = vmul.f32 %v72_v3, %v72_v3  ;;  %v137_v12 = vmul.f32 %v73_v4, %v73_v4 }
   0x9   :  { %v138_v13 = vmul.f32 %v74_v5, %v74_v5  ;;  %v53_v14 = vld [vmem:[#allocation3 + $0x80] sm:$0xff]  ;;  %v139_v15 = vmul.f32 %v75_v9, %v75_v9  ;;  %v140_v16 = vmul.f32 %v76_v10, %v76_v10  ;;  %v169_v17 = vadd.f32 %v134_v7, %v133_v6  ;;  %v54_v18 = vld [vmem:[#allocation3 + $0x88] sm:$0xff]  ;;  %v55_v19 = vld [vmem:[#allocation3 + $0x90] sm:$0xff] }
   0xa   :  { %v56_v20 = vld [vmem:[#allocation3 + $0x98] sm:$0xff]  ;;  %v117_v21 = vmul.f32 %v53_v14, %v53_v14  ;;  %v177_v22 = vadd.f32 %v136_v11, %v135_v8  ;;  %v57_v24 = vld [vmem:[#allocation3 + $0xa0] sm:$0xff]  ;;  %v58_v25 = vld [vmem:[#allocation3 + $0xa8] sm:$0xff]  ;;  %v118_v27 = vmul.f32 %v54_v18, %v54_v18  ;;  %v119_v28 = vmul.f32 %v55_v19, %v55_v19 }
   0xb   :  { %v185_v23 = vadd.f32 %v138_v13, %v137_v12  ;;  %v59_v26 = vld [vmem:[#allocation3 + $0xb0] sm:$0xff]  ;;  %v193_v29 = vadd.f32 %v140_v16, %v139_v15  ;;  %v60_v30 = vld [vmem:[#allocation3 + $0xb8] sm:$0xff]  ;;  %v120_v31 = vmul.f32 %v56_v20, %v56_v20  ;;  %v121_v32 = vmul.f32 %v57_v24, %v57_v24  ;;  %v37_v34 = vld [vmem:[#allocation3] sm:$0xff] }
   0xc   :  { %v122_v33 = vmul.f32 %v58_v25, %v58_v25  ;;  %v38_v35 = vld [vmem:[#allocation3 + $0x8] sm:$0xff]  ;;  %v201_v36 = vadd.f32 %v177_v22, %v169_v17  ;;  %v123_v37 = vmul.f32 %v59_v26, %v59_v26  ;;  %v124_v38 = vmul.f32 %v60_v30, %v60_v30  ;;  %v39_v40 = vld [vmem:[#allocation3 + $0x10] sm:$0xff]  ;;  %v40_v41 = vld [vmem:[#allocation3 + $0x18] sm:$0xff] }
   0xd   :  { %v167_v39 = vadd.f32 %v118_v27, %v117_v21  ;;  %v41_v42 = vld [vmem:[#allocation3 + $0x20] sm:$0xff]  ;;  %v209_v43 = vadd.f32 %v193_v29, %v185_v23  ;;  %v175_v44 = vadd.f32 %v120_v31, %v119_v28  ;;  %v42_v46 = vld [vmem:[#allocation3 + $0x28] sm:$0xff]  ;;  %v43_v47 = vld [vmem:[#allocation3 + $0x30] sm:$0xff]  ;;  %v101_v49 = vmul.f32 %v37_v34, %v37_v34 }
   0xe   :  { %v183_v45 = vadd.f32 %v122_v33, %v121_v32  ;;  %v44_v48 = vld [vmem:[#allocation3 + $0x38] sm:$0xff]  ;;  %v191_v50 = vadd.f32 %v124_v38, %v123_v37  ;;  %v102_v51 = vmul.f32 %v38_v35, %v38_v35  ;;  %v103_v52 = vmul.f32 %v39_v40, %v39_v40  ;;  %v77_v54 = vld [vmem:[#allocation3 + $0x140] sm:$0xff]  ;;  %v78_v55 = vld [vmem:[#allocation3 + $0x148] sm:$0xff] }
   0xf   :  { %v104_v53 = vmul.f32 %v40_v41, %v40_v41  ;;  %v217_v56 = vadd.f32 %v209_v43, %v201_v36  ;;  %v199_v57 = vadd.f32 %v175_v44, %v167_v39  ;;  %v105_v58 = vmul.f32 %v41_v42, %v41_v42  ;;  %v79_v60 = vld [vmem:[#allocation3 + $0x150] sm:$0xff]  ;;  %v80_v61 = vld [vmem:[#allocation3 + $0x158] sm:$0xff]  ;;  %v81_v2 = vld [vmem:[#allocation3 + $0x160] sm:$0xff] }
  0x10   :  { %v106_v59 = vmul.f32 %v42_v46, %v42_v46  ;;  %v207_v62 = vadd.f32 %v191_v50, %v183_v45  ;;  %v107_v63 = vmul.f32 %v43_v47, %v43_v47  ;;  %v108_v0 = vmul.f32 %v44_v48, %v44_v48  ;;  %v82_v3 = vld [vmem:[#allocation3 + $0x168] sm:$0xff]  ;;  %v83_v4 = vld [vmem:[#allocation3 + $0x170] sm:$0xff]  ;;  %v84_v7 = vld [vmem:[#allocation3 + $0x178] sm:$0xff] }
  0x11   :  { %v165_v1 = vadd.f32 %v102_v51, %v101_v49  ;;  %264 = vadd.xlane.f32.xlu2 %v217_v56  ;;  %v173_v5 = vadd.f32 %v104_v53, %v103_v52  ;;  %v141_v8 = vmul.f32 %v77_v54, %v77_v54  ;;  %v142_v9 = vmul.f32 %v78_v55, %v78_v55  ;;  %v61_v14 = vld [vmem:[#allocation3 + $0xc0] sm:$0xff]  ;;  %v62_v15 = vld [vmem:[#allocation3 + $0xc8] sm:$0xff]  ;;  %v63_v16 = vld [vmem:[#allocation3 + $0xd0] sm:$0xff] }
  0x12   :  { %v181_v6 = vadd.f32 %v106_v59, %v105_v58  ;;  %v215_v10 = vadd.f32 %v207_v62, %v199_v57  ;;  %v189_v11 = vadd.f32 %v108_v0, %v107_v63  ;;  %v143_v12 = vmul.f32 %v79_v60, %v79_v60  ;;  %v64_v21 = vld [vmem:[#allocation3 + $0xd8] sm:$0xff]  ;;  %v65_v22 = vld [vmem:[#allocation3 + $0xe0] sm:$0xff]  ;;  %v66_v27 = vld [vmem:[#allocation3 + $0xe8] sm:$0xff] }
  0x13   :  { %v144_v13 = vmul.f32 %v80_v61, %v80_v61  ;;  %v197_v17 = vadd.f32 %v173_v5, %v165_v1  ;;  %v145_v18 = vmul.f32 %v81_v2, %v81_v2  ;;  %v146_v19 = vmul.f32 %v82_v3, %v82_v3  ;;  %v67_v28 = vld [vmem:[#allocation3 + $0xf0] sm:$0xff]  ;;  %v68_v29 = vld [vmem:[#allocation3 + $0xf8] sm:$0xff]  ;;  %v45_v34 = vld [vmem:[#allocation3 + $0x40] sm:$0xff] }
  0x14   :  { %v147_v20 = vmul.f32 %v83_v4, %v83_v4  ;;  %260 = vadd.xlane.f32.xlu1 %v215_v10  ;;  %v205_v23 = vadd.f32 %v189_v11, %v181_v6  ;;  %v148_v24 = vmul.f32 %v84_v7, %v84_v7  ;;  %v170_v25 = vadd.f32 %v142_v9, %v141_v8  ;;  %v46_v39 = vld [vmem:[#allocation3 + $0x48] sm:$0xff]  ;;  %v47_v40 = vld [vmem:[#allocation3 + $0x50] sm:$0xff]  ;;  %v48_v45 = vld [vmem:[#allocation3 + $0x58] sm:$0xff] }
  0x15   :  { %v178_v26 = vadd.f32 %v144_v13, %v143_v12  ;;  %v186_v30 = vadd.f32 %v146_v19, %v145_v18  ;;  %v125_v31 = vmul.f32 %v61_v14, %v61_v14  ;;  %v126_v32 = vmul.f32 %v62_v15, %v62_v15  ;;  %v49_v46 = vld [vmem:[#allocation3 + $0x60] sm:$0xff]  ;;  %v50_v50 = vld [vmem:[#allocation3 + $0x68] sm:$0xff]  ;;  %v51_v51 = vld [vmem:[#allocation3 + $0x70] sm:$0xff] }
  0x16   :  { %v127_v33 = vmul.f32 %v63_v16, %v63_v16  ;;  %v213_v35 = vadd.f32 %v205_v23, %v197_v17  ;;  %v194_v36 = vadd.f32 %v148_v24, %v147_v20  ;;  %v128_v38 = vmul.f32 %v64_v21, %v64_v21  ;;  %v52_v52 = vld [vmem:[#allocation3 + $0x78] sm:$0xff]  ;;  %v93_v58 = vld [vmem:[#allocation3 + $0x1c0] sm:$0xff]  ;;  %v94_v59 = vld [vmem:[#allocation3 + $0x1c8] sm:$0xff] }
  0x17   :  { %v202_v37 = vadd.f32 %v178_v26, %v170_v25  ;;  %v129_v41 = vmul.f32 %v65_v22, %v65_v22  ;;  %v130_v42 = vmul.f32 %v66_v27, %v66_v27  ;;  %v131_v43 = vmul.f32 %v67_v28, %v67_v28  ;;  %v95_v0 = vld [vmem:[#allocation3 + $0x1d0] sm:$0xff]  ;;  %v96_v5 = vld [vmem:[#allocation3 + $0x1d8] sm:$0xff]  ;;  %v97_v6 = vld [vmem:[#allocation3 + $0x1e0] sm:$0xff] }
  0x18   :  { %v132_v44 = vmul.f32 %v68_v29, %v68_v29  ;;  %256 = vadd.xlane.f32.xlu0 %v213_v35  ;;  %v210_v47 = vadd.f32 %v194_v36, %v186_v30  ;;  %v168_v48 = vadd.f32 %v126_v32, %v125_v31  ;;  %v176_v49 = vadd.f32 %v128_v38, %v127_v33  ;;  %v98_v7 = vld [vmem:[#allocation3 + $0x1e8] sm:$0xff]  ;;  %v99_v10 = vld [vmem:[#allocation3 + $0x1f0] sm:$0xff]  ;;  %v100_v11 = vld [vmem:[#allocation3 + $0x1f8] sm:$0xff] }
  0x19   :  { %v109_v53 = vmul.f32 %v45_v34, %v45_v34  ;;  %v184_v54 = vadd.f32 %v130_v42, %v129_v41  ;;  %v110_v56 = vmul.f32 %v46_v39, %v46_v39  ;;  %v111_v57 = vmul.f32 %v47_v40, %v47_v40  ;;  %v85_v18 = vld [vmem:[#allocation3 + $0x180] sm:$0xff]  ;;  %v86_v19 = vld [vmem:[#allocation3 + $0x188] sm:$0xff]  ;;  %v87_v24 = vld [vmem:[#allocation3 + $0x190] sm:$0xff] }
  0x1a   :  { %v192_v55 = vadd.f32 %v132_v44, %v131_v43  ;;  %v218_v60 = vadd.f32 %v210_v47, %v202_v37  ;;  %v200_v61 = vadd.f32 %v176_v49, %v168_v48  ;;  %v112_v62 = vmul.f32 %v48_v45, %v48_v45  ;;  %v88_v25 = vld [vmem:[#allocation3 + $0x198] sm:$0xff]  ;;  %v89_v30 = vld [vmem:[#allocation3 + $0x1a0] sm:$0xff]  ;;  %v90_v31 = vld [vmem:[#allocation3 + $0x1a8] sm:$0xff] }
  0x1b   :  { %v113_v63 = vmul.f32 %v49_v46, %v49_v46  ;;  %v114_v2 = vmul.f32 %v50_v50, %v50_v50  ;;  %v115_v3 = vmul.f32 %v51_v51, %v51_v51  ;;  %v116_v4 = vmul.f32 %v52_v52, %v52_v52  ;;  %v91_v32 = vld [vmem:[#allocation3 + $0x1b0] sm:$0xff]  ;;  %v92_v35 = vld [vmem:[#allocation3 + $0x1b8] sm:$0xff] }
  0x1c   :  { %v208_v1 = vadd.f32 %v192_v55, %v184_v54  ;;  %266 = vadd.xlane.f32.xlu2 %v218_v60  ;;  %v166_v8 = vadd.f32 %v110_v56, %v109_v53  ;;  %v174_v9 = vadd.f32 %v112_v62, %v111_v57  ;;  %v157_v12 = vmul.f32 %v93_v58, %v93_v58 }
  0x1d   :  { %v158_v13 = vmul.f32 %v94_v59, %v94_v59  ;;  %v182_v15 = vadd.f32 %v114_v2, %v113_v63  ;;  %v190_v16 = vadd.f32 %v116_v4, %v115_v3  ;;  %v159_v17 = vmul.f32 %v95_v0, %v95_v0 }
  0x1e   :  { %v216_v14 = vadd.f32 %v208_v1, %v200_v61  ;;  %v198_v20 = vadd.f32 %v174_v9, %v166_v8  ;;  %v160_v21 = vmul.f32 %v96_v5, %v96_v5  ;;  %v161_v22 = vmul.f32 %v97_v6, %v97_v6 }
  0x1f   :  { %v162_v23 = vmul.f32 %v98_v7, %v98_v7  ;;  %v206_v26 = vadd.f32 %v190_v16, %v182_v15  ;;  %v163_v27 = vmul.f32 %v99_v10, %v99_v10  ;;  %v164_v28 = vmul.f32 %v100_v11, %v100_v11 }
  0x20   :  { %262 = vadd.xlane.f32.xlu1 %v216_v14  ;;  %v172_v29 = vadd.f32 %v158_v13, %v157_v12  ;;  %v180_v33 = vadd.f32 %v160_v21, %v159_v17  ;;  %v149_v36 = vmul.f32 %v85_v18, %v85_v18  ;;  %v150_v37 = vmul.f32 %v86_v19, %v86_v19 }
  0x21   :  { %v188_v34 = vadd.f32 %v162_v23, %v161_v22  ;;  %v214_v38 = vadd.f32 %v206_v26, %v198_v20  ;;  %v196_v39 = vadd.f32 %v164_v28, %v163_v27  ;;  %v151_v40 = vmul.f32 %v87_v24, %v87_v24 }
  0x22   :  { %v152_v41 = vmul.f32 %v88_v25, %v88_v25  ;;  %v204_v42 = vadd.f32 %v180_v33, %v172_v29  ;;  %v153_v43 = vmul.f32 %v89_v30, %v89_v30  ;;  %v154_v44 = vmul.f32 %v90_v31, %v90_v31 }
  0x23   :  { %v155_v45 = vmul.f32 %v91_v32, %v91_v32  ;;  %258 = vadd.xlane.f32.xlu0 %v214_v38  ;;  %v212_v46 = vadd.f32 %v196_v39, %v188_v34  ;;  %v156_v47 = vmul.f32 %v92_v35, %v92_v35  ;;  %v171_v48 = vadd.f32 %v150_v37, %v149_v36 }
  0x24   :  { %v179_v49 = vadd.f32 %v152_v41, %v151_v40  ;;  %v187_v50 = vadd.f32 %v154_v44, %v153_v43 }
  0x25   :  { %v220_v51 = vadd.f32 %v212_v46, %v204_v42  ;;  %v195_v52 = vadd.f32 %v156_v47, %v155_v45 }
  0x26   :  { %v203_v53 = vadd.f32 %v179_v49, %v171_v48 }
  0x27   :  { %v211_v54 = vadd.f32 %v195_v52, %v187_v50 }
  0x28   :  { %270 = vadd.xlane.f32.xlu1 %v220_v51 }
  0x29   :  { %v219_v55 = vadd.f32 %v211_v54, %v203_v53 }
  0x2b   :  { %268 = vadd.xlane.f32.xlu0 %v219_v55 }
  0x84   :  { %v563_v56 = vpop.xlane.xlu2 %264 }
  0x85   :  { %478 = vrsqrt.f32 %v563_v56  ;;  %vm327_vm0 = vcmp.eq.f32.partialorder %v563_v56, inf  ;;  %v330_v25 = vand.u32 2147483648, %v563_v56  ;;  %vm329_vm3 = vcmp.eq.f32.partialorder %v563_v56, 0.0 }
  0x87   :  { %v566_v57 = vpop.xlane.xlu1 %260 }
  0x88   :  { %480 = vrsqrt.f32 %v566_v57  ;;  %vm303_vm1 = vcmp.eq.f32.partialorder %v566_v57, inf  ;;  %vm305_vm4 = vcmp.eq.f32.partialorder %v566_v57, 0.0  ;;  %v306_v40 = vand.u32 2147483648, %v566_v57 }
  0x8b   :  { %v479_v58 = vpop.eup %478  ;;  %v257_v59 = vpop.xlane.xlu0 %256 }
  0x8c   :  { %v321_v60 = vmul.f32 %v479_v58, %v563_v56  ;;  %482 = vrsqrt.f32 %v257_v59  ;;  %vm279_vm2 = vcmp.eq.f32.partialorder %v257_v59, inf  ;;  %v282_v35 = vand.u32 2147483648, %v257_v59 }
  0x8d   :  { %vm281_vm5 = vcmp.eq.f32.partialorder %v257_v59, 0.0 }
  0x8e   :  { %v481_v61 = vpop.eup %480  ;;  %v322_v0 = vmul.f32 %v479_v58, %v321_v60 }
  0x8f   :  { %v297_v62 = vmul.f32 %v481_v61, %v566_v57  ;;  %v571_v63 = vpop.xlane.xlu2 %266 }
  0x90   :  { %484 = vrsqrt.f32 %v571_v63  ;;  %v323_v6 = vmul.f32 0.5, %v322_v0  ;;  %vm339_vm8 = vcmp.eq.f32.partialorder %v571_v63, inf  ;;  %vm341_vm9 = vcmp.eq.f32.partialorder %v571_v63, 0.0 }
  0x91   :  { %v298_v1 = vmul.f32 %v481_v61, %v297_v62  ;;  %v342_v0 = vand.u32 2147483648, %v571_v63 }
  0x92   :  { %v483_v2 = vpop.eup %482  ;;  %v324_v13 = vsub.f32 1.5, %v323_v6 }
  0x93   :  { %v574_v3 = vpop.xlane.xlu1 %262  ;;  %v299_v4 = vmul.f32 0.5, %v298_v1  ;;  %v273_v5 = vmul.f32 %v483_v2, %v257_v59 }
  0x94   :  { %486 = vrsqrt.f32 %v574_v3  ;;  %v325_v22 = vmul.f32 %v479_v58, %v324_v13  ;;  %vm315_vm6 = vcmp.eq.f32.partialorder %v574_v3, inf  ;;  %vm317_vm7 = vcmp.eq.f32.partialorder %v574_v3, 0.0 }
  0x95   :  { %v300_v7 = vsub.f32 1.5, %v299_v4  ;;  %v274_v8 = vmul.f32 %v483_v2, %v273_v5  ;;  %v318_v52 = vand.u32 2147483648, %v574_v3 }
  0x96   :  { %v485_v9 = vpop.eup %484  ;;  %v577_v10 = vpop.xlane.xlu0 %258  ;;  %v326_v34 = vmul.f32 %v325_v22, %v563_v56 }
  0x97   :  { %v275_v11 = vmul.f32 0.5, %v274_v8  ;;  %v333_v12 = vmul.f32 %v485_v9, %v571_v63  ;;  %488 = vrsqrt.f32 %v577_v10  ;;  %v301_v15 = vmul.f32 %v481_v61, %v300_v7 }
  0x98   :  { %v328_v49 = vsel %vm327_vm0, %v563_v56, %v326_v34  ;;  %vm291_vm10 = vcmp.eq.f32.partialorder %v577_v10, inf  ;;  %vm293_vm11 = vcmp.eq.f32.partialorder %v577_v10, 0.0  ;;  %v294_v5 = vand.u32 2147483648, %v577_v10 }
  0x99   :  { %v276_v16 = vsub.f32 1.5, %v275_v11  ;;  %v334_v17 = vmul.f32 %v485_v9, %v333_v12  ;;  %v302_v26 = vmul.f32 %v301_v15, %v566_v57  ;;  %v331_v62 = vsel %vm329_vm3, %v330_v25, %v328_v49 }
  0x9a   :  { %v487_v14 = vpop.eup %486  ;;  %v372_v12 = vadd.f32 1.0, %v331_v62 }
  0x9b   :  { %v309_v18 = vmul.f32 %v487_v14, %v574_v3  ;;  %v582_v19 = vpop.xlane.xlu1 %270  ;;  %v277_v20 = vmul.f32 %v483_v2, %v276_v16  ;;  %v335_v21 = vmul.f32 0.5, %v334_v17  ;;  %v304_v39 = vsel %vm303_vm1, %v566_v57, %v302_v26 }
  0x9c   :  { %490 = vrsqrt.f32 %v582_v19  ;;  %v307_v53 = vsel %vm305_vm4, %v306_v40, %v304_v39  ;;  %vm363_vm12 = vcmp.eq.f32.partialorder %v582_v19, inf  ;;  %vm365_vm14 = vcmp.eq.f32.partialorder %v582_v19, 0.0 }
  0x9d   :  { %v310_v23 = vmul.f32 %v487_v14, %v309_v18  ;;  %v489_v24 = vpop.eup %488  ;;  %v278_v27 = vmul.f32 %v277_v20, %v257_v59  ;;  %v336_v28 = vsub.f32 1.5, %v335_v21  ;;  %v370_v4 = vadd.f32 1.0, %v307_v53 }
  0x9e   :  { %v285_v30 = vmul.f32 %v489_v24, %v577_v10  ;;  %v590_v31 = vpop.xlane.xlu0 %268  ;;  %vm453_vm1 = vcmask 0  }
  0x9f   :  { %v311_v29 = vmul.f32 0.5, %v310_v23  ;;  %v280_v32 = vsel %vm279_vm2, %v257_v59, %v278_v27  ;;  %v337_v33 = vmul.f32 %v485_v9, %v336_v28  ;;  %492 = vrsqrt.f32 %v590_v31 }
  0xa0   :  { %v286_v37 = vmul.f32 %v489_v24, %v285_v30  ;;  %v283_v42 = vsel %vm281_vm5, %v282_v35, %v280_v32  ;;  %v378_v16 = vsub.f32 %v307_v53, %v370_v4  ;;  %vm351_vm15 = vcmp.eq.f32.partialorder %v590_v31, inf }
  0xa1   :  { %v312_v36 = vsub.f32 1.5, %v311_v29  ;;  %v338_v41 = vmul.f32 %v337_v33, %v571_v63  ;;  %v368_v51 = vadd.f32 1.0, %v283_v42  ;;  %v354_v28 = vand.u32 2147483648, %v590_v31 }
  0xa2   :  { %v491_v38 = vpop.eup %490  ;;  %v287_v44 = vmul.f32 0.5, %v286_v37  ;;  %v386_v27 = vmul.f32 %v378_v16, %v378_v16  ;;  %vm353_vm0 = vcmp.eq.f32.partialorder %v590_v31, 0.0 }
  0xa3   :  { %v313_v43 = vmul.f32 %v487_v14, %v312_v36  ;;  %v357_v45 = vmul.f32 %v491_v38, %v582_v19  ;;  %v340_v54 = vsel %vm339_vm8, %v571_v63, %v338_v41  ;;  %v376_v7 = vsub.f32 %v283_v42, %v368_v51 }
  0xa4   :  { %v288_v47 = vsub.f32 1.5, %v287_v44  ;;  %v343_v6 = vsel %vm341_vm9, %v342_v0, %v340_v54  ;;  %v366_v63 = vand.u32 2147483648, %v582_v19  ;;  %v431_v39 = vsel %vm427_vm13, %v386_v27, 0.0 }
  0xa5   :  { %v314_v46 = vmul.f32 %v313_v43, %v574_v3  ;;  %v358_v48 = vmul.f32 %v491_v38, %v357_v45  ;;  %v493_v50 = vpop.eup %492  ;;  %v373_v17 = vadd.f32 1.0, %v343_v6  ;;  %v384_v18 = vmul.f32 %v376_v7, %v376_v7 }
  0xa6   :  { %v289_v58 = vmul.f32 %v489_v24, %v288_v47  ;;  %v345_v60 = vmul.f32 %v493_v50, %v590_v31  ;;  %v380_v24 = vsub.f32 %v331_v62, %v372_v12 }
  0xa7   :  { %v316_v55 = vsel %vm315_vm6, %v574_v3, %v314_v46  ;;  %v359_v59 = vmul.f32 0.5, %v358_v48  ;;  %v381_v29 = vsub.f32 %v343_v6, %v373_v17  ;;  %v428_v30 = vsel %vm427_vm13, %v384_v18, 0.0 }
  0xa8   :  { %v319_v61 = vsel %vm317_vm7, %v318_v52, %v316_v55  ;;  %v290_v57 = vmul.f32 %v289_v58, %v577_v10  ;;  %v346_v2 = vmul.f32 %v493_v50, %v345_v60 }
  0xa9   :  { %v360_v1 = vsub.f32 1.5, %v359_v59  ;;  %v371_v9 = vadd.f32 1.0, %v319_v61  ;;  %v389_v43 = vmul.f32 %v381_v29, %v381_v29 }
  0xaa   :  { %v292_v3 = vsel %vm291_vm10, %v577_v10, %v290_v57  ;;  %v347_v56 = vmul.f32 0.5, %v346_v2 }
  0xab   :  { %v361_v8 = vmul.f32 %v491_v38, %v360_v1  ;;  %v295_v11 = vsel %vm293_vm11, %v294_v5, %v292_v3  ;;  %v379_v22 = vsub.f32 %v319_v61, %v371_v9  ;;  %v388_v38 = vmul.f32 %v380_v24, %v380_v24 }
  0xac   :  { %v369_v13 = vadd.f32 1.0, %v295_v11  ;;  %v348_v15 = vsub.f32 1.5, %v347_v56  ;;  %v437_v49 = vsel %vm427_vm13, %v389_v43, 0.0 }
  0xad   :  { %v362_v14 = vmul.f32 %v361_v8, %v582_v19  ;;  %v387_v33 = vmul.f32 %v379_v22, %v379_v22 }
  0xae   :  { %v349_v10 = vmul.f32 %v493_v50, %v348_v15  ;;  %v377_v21 = vsub.f32 %v295_v11, %v369_v13 }
  0xaf   :  { %v364_v20 = vsel %vm363_vm12, %v582_v19, %v362_v14  ;;  %v433_v44 = vsel %vm427_vm13, %v387_v33, 0.0 }
  0xb0   :  { %v367_v23 = vsel %vm365_vm14, %v366_v63, %v364_v20  ;;  %v350_v25 = vmul.f32 %v349_v10, %v590_v31  ;;  %v385_v26 = vmul.f32 %v377_v21, %v377_v21 }
  0xb1   :  { %v375_v19 = vadd.f32 1.0, %v367_v23 }
  0xb2   :  { %v352_v32 = vsel %vm351_vm15, %v590_v31, %v350_v25  ;;  %v429_v34 = vsel %vm427_vm13, %v385_v26, 0.0  ;;  %v435_v31 = vsel %vm427_vm13, %v388_v38, 0.0 }
  0xb3   :  { %v355_v35 = vsel %vm353_vm0, %v354_v28, %v352_v32  ;;  %v430_v36 = vadd.f32 %v429_v34, %v428_v30  ;;  %v383_v42 = vsub.f32 %v367_v23, %v375_v19 }
  0xb4   :  { %v374_v37 = vadd.f32 1.0, %v355_v35 }
  0xb5   :  { %v432_v40 = vadd.f32 %v431_v39, %v430_v36  ;;  %v391_v48 = vmul.f32 %v383_v42, %v383_v42 }
  0xb6   :  { %v382_v41 = vsub.f32 %v355_v35, %v374_v37 }
  0xb7   :  { %v434_v45 = vadd.f32 %v433_v44, %v432_v40  ;;  %v441_v53 = vsel %vm427_vm13, %v391_v48, 0.0 }
  0xb8   :  { %v390_v46 = vmul.f32 %v382_v41, %v382_v41 }
  0xb9   :  { %v436_v47 = vadd.f32 %v435_v31, %v434_v45 }
  0xba   :  { %v439_v51 = vsel %vm427_vm13, %v390_v46, 0.0 }
  0xbb   :  { %v438_v50 = vadd.f32 %v437_v49, %v436_v47 }
  0xbd   :  { %v440_v52 = vadd.f32 %v439_v51, %v438_v50 }
  0xbf   :  { %v442_v54 = vadd.f32 %v441_v53, %v440_v52 }
  0xc1   :  { %443 = vadd.xlane.f32.xlu2 %v442_v54 }
 0x134   :  { %v444_v55 = vpop.xlane.xlu2 %443 }
 0x135   :  { %v445_v58 = vrot.slane %v444_v55, 4 }
 0x137   :  { %v446_v59 = vadd.f32 %v445_v58, %v444_v55 }
 0x139   :  { %v447_v60 = vrot.slane %v446_v59, 2 }
 0x13b   :  { %v448_v61 = vadd.f32 %v447_v60, %v446_v59 }
 0x13d   :  { %v449_v62 = vrot.slane %v448_v61, 1 }
 0x13f   :  { %v450_v0 = vadd.f32 %v449_v62, %v448_v61 }
 0x141   :  { %472 = vpush %v450_v0 }
 0x172   :  { %s473_s17 = spop %472 }
 0x173   :  { %v452_v57 = vstv %s473_s17 }
 0x174   :  { %454 = vst.msk [vmem:[#allocation6] sm:$0x1] %vm453_vm1, %v452_v57 }
 0x175   :  { %465 = dma.vmem_to_hbm [thread:$0]  %s461_s13, 16, %s463_s16, [#allocation5]  }
 0x176   :  { %544 = dma.done.wait [#allocation5], 16  }
 0x177   :  { %545 = vsyncadd [#allocation5], 4294967280 }
 0x178   :  { %470 = vsyncpa [#allocation4], 1 }
 0x179   :  { %471 = vsyncpa [#allocation5], 1 }

</bundles_post_ra>
